<compile_context>
chip_gen: v5e
topology: v5e:2x2
jax: 0.10.0
libtpu: 0.0.40
codegen_flags: <defaults>
</compile_context>

<pallas_src>
import functools
import math

import jax
import jax.numpy as jnp
from jax.experimental import pallas as pl
from jax.experimental.pallas import tpu as pltpu


def _round_up(a, b):
    return (a + b - 1) // b * b


def _cdiv(a, b):
    return -(-a // b)


def _time_modulator_kernel(sin_ref, cos_ref, x_ref,
                           was_ref, wac_ref, wbs_ref, wbc_ref,
                           o_ref, *, precision):
    """One row-tile of the fused modulation.

    sin_ref/cos_ref : (tile, Mk)  time embeddings (possibly row-packed)
    x_ref           : (tile, Ek)  features (lane-dense, possibly row-packed)
    w??_ref         : (Mk, Ek)    weights (kron'd block-diagonal when packed)
    o_ref           : (tile, Ek)  output
    """
    sin = sin_ref[...]
    cos = cos_ref[...]
    alpha = (jnp.dot(sin, was_ref[...], precision=precision,
                     preferred_element_type=jnp.float32)
             + jnp.dot(cos, wac_ref[...], precision=precision,
                       preferred_element_type=jnp.float32))
    beta = (jnp.dot(sin, wbs_ref[...], precision=precision,
                    preferred_element_type=jnp.float32)
            + jnp.dot(cos, wbc_ref[...], precision=precision,
                      preferred_element_type=jnp.float32))
    o_ref[...] = (x_ref[...].astype(jnp.float32) * alpha + beta
                  ).astype(o_ref.dtype)


@functools.partial(jax.jit, static_argnames=("tile_rows",))
def time_modulator_forward(x, sin_emb, cos_emb,
                           alpha_sin, alpha_cos, beta_sin, beta_cos,
                           tile_rows=1024):
    """x: (B, S, E), sin_emb/cos_emb: (B, S, M), weights: (M, E) -> (B, S, E)."""
    B, S, E = x.shape
    M = sin_emb.shape[-1]
    N = B * S
    dtype = x.dtype

    # Stream embeddings/weights at the feature dtype when it is bf16 (halves
    # embedding HBM traffic); MXU accumulation is f32 either way.
    emb_dtype = jnp.bfloat16 if dtype == jnp.bfloat16 else jnp.float32
    precision = (jax.lax.Precision.HIGHEST if emb_dtype == jnp.float32
                 else jax.lax.Precision.DEFAULT)

    # ---- Lane-dense packing of the feature dimension ------------------------
    if E % 128 == 0:
        P, E_pad = 1, E
    elif E < 128 and 128 % E == 0:
        P, E_pad = 128 // E, E                  # pack P rows per 128-lane row
    else:
        P, E_pad = 1, _round_up(E, 128)         # zero-pad features to 128-mult
    Ek = P * E_pad
    Mk = P * M

    # ---- Tile sizing: VMEM-budgeted, sublane aligned, >=4 grid steps --------
    x_bytes = jnp.dtype(dtype).itemsize
    e_bytes = jnp.dtype(emb_dtype).itemsize
    sub = max(8, 32 // min(x_bytes, e_bytes))   # 8 (f32) / 16 (bf16)

    # Double-buffered streaming blocks (sin + cos + x + out) + the four
    # double-buffered weight blocks + f32 alpha/beta temporaries.
    w_vmem = 4 * Mk * Ek * e_bytes * 2
    per_row = 2 * (2 * Mk * e_bytes + 2 * Ek * x_bytes) + 2 * Ek * 4
    budget = 24 * 1024 * 1024
    max_tile = max(sub, ((budget - w_vmem) // per_row) // sub * sub)

    n_rows = _cdiv(N, P)                        # packed logical rows
    tile = min(_round_up(tile_rows, sub), max_tile, _round_up(n_rows, sub))
    tile = max(tile, sub)
    # v7x has 2 TensorCores: the "parallel" grid axis needs >1 (ideally >=4)
    # steps to use both. Redistribute the rows instead of rounding N up to a
    # large tile multiple (keeps padding waste <= steps*sub rows).
    steps = _cdiv(n_rows, tile)
    steps = max(steps, min(4, _cdiv(n_rows, sub)))
    tile = _round_up(_cdiv(n_rows, steps), sub)
    steps = _cdiv(n_rows, tile)
    n_rows_pad = steps * tile
    N_pad = n_rows_pad * P

    vmem_limit = int(min(40 * 1024 * 1024,
                         max(32 * 1024 * 1024, w_vmem + tile * per_row + (4 << 20))))

    # ---- Prepare inputs (pads are skipped entirely when not needed) ---------
    def _prep_rows(a, ncols):
        if N_pad != N:
            a = jnp.pad(a, ((0, N_pad - N), (0, 0)))
        return a.reshape(n_rows_pad, ncols)

    x2 = x.reshape(N, E)
    if E_pad != E:
        x2 = jnp.pad(x2, ((0, 0), (0, E_pad - E)))
    x2 = _prep_rows(x2, Ek)
    sin2 = _prep_rows(sin_emb.reshape(N, M).astype(emb_dtype), Mk)
    cos2 = _prep_rows(cos_emb.reshape(N, M).astype(emb_dtype), Mk)

    # Weights (tiny). If the weights are static across calls these could be
    # pre-fused once outside the jit and passed in directly.
    def _prep_w(w):
        w = w.astype(emb_dtype)
        if E_pad != E:
            w = jnp.pad(w, ((0, 0), (0, E_pad - E)))
        if P > 1:
            w = jnp.kron(jnp.eye(P, dtype=emb_dtype), w)   # block-diagonal
        return w

    was, wac, wbs, wbc = (_prep_w(w) for w in
                          (alpha_sin, alpha_cos, beta_sin, beta_cos))

    flops = int(8 * N * M * E + 2 * N * E)
    bytes_accessed = int(2 * e_bytes * N_pad * M          # sin + cos
                         + 2 * x_bytes * N_pad * E_pad    # x + out
                         + 4 * Mk * Ek * e_bytes)         # weights

    out2 = pl.pallas_call(
        functools.partial(_time_modulator_kernel, precision=precision),
        out_shape=jax.ShapeDtypeStruct((n_rows_pad, Ek), dtype),
        grid_spec=pltpu.PrefetchScalarGridSpec(
            num_scalar_prefetch=0,
            grid=(steps,),
            in_specs=[
                pl.BlockSpec((tile, Mk), lambda i: (i, 0)),   # sin rows
                pl.BlockSpec((tile, Mk), lambda i: (i, 0)),   # cos rows
                pl.BlockSpec((tile, Ek), lambda i: (i, 0)),   # x rows (lane-dense)
                pl.BlockSpec((Mk, Ek), lambda i: (0, 0)),     # alpha_sin (fused)
                pl.BlockSpec((Mk, Ek), lambda i: (0, 0)),     # alpha_cos (fused)
                pl.BlockSpec((Mk, Ek), lambda i: (0, 0)),     # beta_sin  (fused)
                pl.BlockSpec((Mk, Ek), lambda i: (0, 0)),     # beta_cos  (fused)
            ],
            out_specs=pl.BlockSpec((tile, Ek), lambda i: (i, 0)),
        ),
        compiler_params=pltpu.CompilerParams(
            dimension_semantics=("parallel",),
            vmem_limit_bytes=vmem_limit),
        cost_estimate=pl.CostEstimate(flops=flops, transcendentals=0,
                                      bytes_accessed=bytes_accessed),
    )(sin2, cos2, x2, was, wac, wbs, wbc)

    return out2.reshape(N_pad, E_pad)[:N, :E].reshape(B, S, E)


def get_sin_cos(t, M, T_max):
    """t: (B, S, 1) -> sin/cos embeddings of shape (B, S, M).

    Mirrors TimeModulator.get_sin / get_cos (pure glue, computed in JAX)."""
    ar = jnp.arange(M, dtype=jnp.float32)[None, None, :]          # (1, 1, M)
    phase = 2.0 * math.pi * ar * t / T_max                        # (B, S, M)
    return jnp.sin(phase), jnp.cos(phase)


def _reference(x, sin_emb, cos_emb, a_sin, a_cos, b_sin, b_cos):
    hi = jax.lax.Precision.HIGHEST
    alpha = (jnp.matmul(sin_emb, a_sin, precision=hi)
             + jnp.matmul(cos_emb, a_cos, precision=hi))
    beta = (jnp.matmul(sin_emb, b_sin, precision=hi)
            + jnp.matmul(cos_emb, b_cos, precision=hi))
    return x * alpha + beta


def _run_case(key, B, S, M, E, T_max, atol, rtol):
    k0, k1, k2, k3, k4, k5 = jax.random.split(key, 6)
    a_sin = jax.random.normal(k0, (M, E), dtype=jnp.float32)
    a_cos = jax.random.normal(k1, (M, E), dtype=jnp.float32)
    b_sin = jax.random.normal(k2, (M, E), dtype=jnp.float32)
    b_cos = jax.random.normal(k3, (M, E), dtype=jnp.float32)
    x = jax.random.normal(k4, (B, S, E), dtype=jnp.float32)
    t = jax.random.uniform(k5, (B, S, 1), dtype=jnp.float32) * T_max
    sin_emb, cos_emb = get_sin_cos(t, M, T_max)

    out = time_modulator_forward(x, sin_emb, cos_emb,
                                 a_sin, a_cos, b_sin, b_cos)
    out = jax.block_until_ready(out)

    ref = _reference(x, sin_emb, cos_emb, a_sin, a_cos, b_sin, b_cos)
    assert out.shape == (B, S, E)
    assert jnp.allclose(out, ref, atol=atol, rtol=rtol), \
        f"mismatch vs reference (B={B}, S={S}, M={M}, E={E})"


if __name__ == "__main__":
    key = jax.random.PRNGKey(0)
    k_small, k_big = jax.random.split(key, 2)

    # Small, module-consistent shapes (exercises row packing, P=4, one step).
    _run_case(k_small, B=2, S=8, M=4, E=32, T_max=100.0, atol=1e-4, rtol=1e-4)

    # Larger shapes (exercises multi-step grid, resident fused weights, no pad).
    _run_case(k_big, B=2, S=512, M=128, E=256, T_max=100.0, atol=2e-3, rtol=2e-3)

    print("KERNEL_OK")
</pallas_src>

<mosaic_0001>
module attributes {stable_mosaic.version = 11 : i64} {
  func.func @_time_modulator_kernel(%arg0: i32, %arg1: memref<8x16xf32, #tpu.memory_space<vmem>>, %arg2: memref<8x16xf32, #tpu.memory_space<vmem>>, %arg3: memref<8x128xf32, #tpu.memory_space<vmem>>, %arg4: memref<16x128xf32, #tpu.memory_space<vmem>>, %arg5: memref<16x128xf32, #tpu.memory_space<vmem>>, %arg6: memref<16x128xf32, #tpu.memory_space<vmem>>, %arg7: memref<16x128xf32, #tpu.memory_space<vmem>>, %arg8: memref<8x128xf32, #tpu.memory_space<vmem>>) attributes {dimension_semantics = [#tpu.dimension_semantics<parallel>], iteration_bounds = array<i64: 1>, scalar_prefetch = 0 : i64, scratch_operands = 0 : i64, tpu.core_type = #tpu.core_type<tc>, window_params = [{transform_indices = @transform_0, window_bounds = array<i64: 8, 16>}, {transform_indices = @transform_1, window_bounds = array<i64: 8, 16>}, {transform_indices = @transform_2, window_bounds = array<i64: 8, 128>}, {pipeline_mode = #tpu.pipeline_mode<synchronous>, transform_indices = @transform_3, window_bounds = array<i64: 16, 128>}, {pipeline_mode = #tpu.pipeline_mode<synchronous>, transform_indices = @transform_4, window_bounds = array<i64: 16, 128>}, {pipeline_mode = #tpu.pipeline_mode<synchronous>, transform_indices = @transform_5, window_bounds = array<i64: 16, 128>}, {pipeline_mode = #tpu.pipeline_mode<synchronous>, transform_indices = @transform_6, window_bounds = array<i64: 16, 128>}, {transform_indices = @transform_7, window_bounds = array<i64: 8, 128>}]} {
    %c0 = arith.constant 0 : index
    %c0_0 = arith.constant 0 : index
    %0 = vector.load %arg1[%c0, %c0_0] : memref<8x16xf32, #tpu.memory_space<vmem>>, vector<8x16xf32>
    %c0_1 = arith.constant 0 : index
    %c0_2 = arith.constant 0 : index
    %1 = vector.load %arg2[%c0_1, %c0_2] : memref<8x16xf32, #tpu.memory_space<vmem>>, vector<8x16xf32>
    %c0_3 = arith.constant 0 : index
    %c0_4 = arith.constant 0 : index
    %2 = vector.load %arg4[%c0_3, %c0_4] : memref<16x128xf32, #tpu.memory_space<vmem>>, vector<16x128xf32>
    %cst = arith.constant dense<0.000000e+00> : vector<8x128xf32>
    %3 = tpu.matmul %0, %2, %cst {dimension_numbers = #tpu.dot_dimension_numbers<[1], [0], [0], [1], [0, 0, 1, 1], [], []>, precision = #tpu.contract_precision<fp32>} : vector<8x16xf32>, vector<16x128xf32>, vector<8x128xf32> -> vector<8x128xf32>
    %c0_5 = arith.constant 0 : index
    %c0_6 = arith.constant 0 : index
    %4 = vector.load %arg5[%c0_5, %c0_6] : memref<16x128xf32, #tpu.memory_space<vmem>>, vector<16x128xf32>
    %cst_7 = arith.constant dense<0.000000e+00> : vector<8x128xf32>
    %5 = tpu.matmul %1, %4, %cst_7 {dimension_numbers = #tpu.dot_dimension_numbers<[1], [0], [0], [1], [0, 0, 1, 1], [], []>, precision = #tpu.contract_precision<fp32>} : vector<8x16xf32>, vector<16x128xf32>, vector<8x128xf32> -> vector<8x128xf32>
    %6 = arith.addf %3, %5 : vector<8x128xf32>
    %c0_8 = arith.constant 0 : index
    %c0_9 = arith.constant 0 : index
    %7 = vector.load %arg6[%c0_8, %c0_9] : memref<16x128xf32, #tpu.memory_space<vmem>>, vector<16x128xf32>
    %cst_10 = arith.constant dense<0.000000e+00> : vector<8x128xf32>
    %8 = tpu.matmul %0, %7, %cst_10 {dimension_numbers = #tpu.dot_dimension_numbers<[1], [0], [0], [1], [0, 0, 1, 1], [], []>, precision = #tpu.contract_precision<fp32>} : vector<8x16xf32>, vector<16x128xf32>, vector<8x128xf32> -> vector<8x128xf32>
    %c0_11 = arith.constant 0 : index
    %c0_12 = arith.constant 0 : index
    %9 = vector.load %arg7[%c0_11, %c0_12] : memref<16x128xf32, #tpu.memory_space<vmem>>, vector<16x128xf32>
    %cst_13 = arith.constant dense<0.000000e+00> : vector<8x128xf32>
    %10 = tpu.matmul %1, %9, %cst_13 {dimension_numbers = #tpu.dot_dimension_numbers<[1], [0], [0], [1], [0, 0, 1, 1], [], []>, precision = #tpu.contract_precision<fp32>} : vector<8x16xf32>, vector<16x128xf32>, vector<8x128xf32> -> vector<8x128xf32>
    %11 = arith.addf %8, %10 : vector<8x128xf32>
    %c0_14 = arith.constant 0 : index
    %c0_15 = arith.constant 0 : index
    %12 = vector.load %arg3[%c0_14, %c0_15] : memref<8x128xf32, #tpu.memory_space<vmem>>, vector<8x128xf32>
    %13 = arith.mulf %12, %6 : vector<8x128xf32>
    %14 = arith.addf %13, %11 : vector<8x128xf32>
    %c0_16 = arith.constant 0 : index
    %c0_17 = arith.constant 0 : index
    %15 = vector.load %arg8[%c0_16, %c0_17] : memref<8x128xf32, #tpu.memory_space<vmem>>, vector<8x128xf32>
    tpu.vector_store %arg8[%c0_16, %c0_17], %14 {strides = array<i32>} : memref<8x128xf32, #tpu.memory_space<vmem>>, vector<8x128xf32>,
    return
  }
  func.func @transform_0(%arg0: i32) -> (i32, i32) {
    %c0_i32 = arith.constant 0 : i32
    %c0_i32_0 = arith.constant 0 : i32
    return %arg0, %c0_i32 : i32, i32
  }
  func.func @transform_1(%arg0: i32) -> (i32, i32) {
    %c0_i32 = arith.constant 0 : i32
    %c0_i32_0 = arith.constant 0 : i32
    return %arg0, %c0_i32 : i32, i32
  }
  func.func @transform_2(%arg0: i32) -> (i32, i32) {
    %c0_i32 = arith.constant 0 : i32
    %c0_i32_0 = arith.constant 0 : i32
    return %arg0, %c0_i32 : i32, i32
  }
  func.func @transform_3(%arg0: i32) -> (i32, i32) {
    %c0_i32 = arith.constant 0 : i32
    %c0_i32_0 = arith.constant 0 : i32
    %c0_i32_1 = arith.constant 0 : i32
    return %c0_i32, %c0_i32_0 : i32, i32
  }
  func.func @transform_4(%arg0: i32) -> (i32, i32) {
    %c0_i32 = arith.constant 0 : i32
    %c0_i32_0 = arith.constant 0 : i32
    %c0_i32_1 = arith.constant 0 : i32
    return %c0_i32, %c0_i32_0 : i32, i32
  }
  func.func @transform_5(%arg0: i32) -> (i32, i32) {
    %c0_i32 = arith.constant 0 : i32
    %c0_i32_0 = arith.constant 0 : i32
    %c0_i32_1 = arith.constant 0 : i32
    return %c0_i32, %c0_i32_0 : i32, i32
  }
  func.func @transform_6(%arg0: i32) -> (i32, i32) {
    %c0_i32 = arith.constant 0 : i32
    %c0_i32_0 = arith.constant 0 : i32
    %c0_i32_1 = arith.constant 0 : i32
    return %c0_i32, %c0_i32_0 : i32, i32
  }
  func.func @transform_7(%arg0: i32) -> (i32, i32) {
    %c0_i32 = arith.constant 0 : i32
    %c0_i32_0 = arith.constant 0 : i32
    return %arg0, %c0_i32 : i32, i32
  }
}

</mosaic_0001>

<bundles_post_ra>
// kernel: time_modulator_forward.1
= control target key start
LH: loop header
LB: loop body
LE: loop exit
PB: predicated region body
PF: predicated region fallthrough
CT: control target
= control target key end

     0   :  { %vm32_vm0 = vcmask 130048   ;;  %s860_s4 = inlined_call_operand.vmem [shape: f32[16,128], index: 4, kind: input, shape index: {}]   ;;  %s861_s0 = inlined_call_operand.vmem [shape: f32[8,16], index: 0, kind: input, shape index: {}]   ;;  %s862_s1 = inlined_call_operand.vmem [shape: f32[8,16], index: 1, kind: input, shape index: {}]   ;;  %s863_s3 = inlined_call_operand.vmem [shape: f32[16,128], index: 3, kind: input, shape index: {}]   ;;  %s864_s6 = inlined_call_operand.vmem [shape: f32[16,128], index: 6, kind: input, shape index: {}]   ;;  %s865_s5 = inlined_call_operand.vmem [shape: f32[16,128], index: 5, kind: input, shape index: {}]   ;;  %s866_s2 = inlined_call_operand.vmem [shape: f32[8,128], index: 2, kind: input, shape index: {}]   ;;  %s867_s7 = inlined_call_operand.vmem [shape: f32[8,128], index: 7, kind: output, shape index: {}]  }
   0x1   :  { %v31_v0 = vld [vmem:[%s860_s4 + $0x8] sm:$0xff]  ;;  %v30_v1 = vld [vmem:[%s860_s4] sm:$0xff] }
   0x2   :  { %v26_v2 = vld [vmem:[%s861_s0] sm:$0xff]  ;;  %v736_v3 = vand.u32 4294901760, %v31_v0  ;;  %v738_v4 = vand.u32 4294901760, %v30_v1  ;;  %v29_v7 = vld [vmem:[%s863_s3 + $0x8] sm:$0xff] }
   0x3   :  { %v27_v5 = vld [vmem:[%s862_s1] sm:$0xff]  ;;  %v196_v6 = vsel %vm32_vm0, %v26_v2, 0  ;;  %v751_v11 = vand.u32 4294901760, %v29_v7  ;;  %v360_v13 = vld [vmem:[%s864_s6 + $0x8] sm:$0xff] }
   0x4   :  { %v28_v8 = vld [vmem:[%s863_s3] sm:$0xff]  ;;  %v34_v9 = vsel %vm32_vm0, %v27_v5, 0  ;;  %v749_v10 = vand.u32 4294901760, %v196_v6  ;;  %v78_v15 = vsub.f32 %v31_v0, %v736_v3  ;;  %51 = vmatpush.msra.mxu0 %v736_v3  ;;  %v84_v16 = vsub.f32 %v30_v1, %v738_v4  ;;  %135 = vmatpush.msra.mxu3 %v736_v3  ;;  %v358_v36 = vld [vmem:[%s865_s5 + $0x8] sm:$0xff] }
   0x5   :  { %v753_v12 = vand.u32 4294901760, %v28_v8  ;;  %v359_v14 = vld [vmem:[%s864_s6] sm:$0xff]  ;;  %v765_v17 = vand.u32 4294901760, %v34_v9  ;;  %v767_v18 = vand.u32 4294901760, %v360_v13  ;;  %v240_v20 = vsub.f32 %v29_v7, %v751_v11 }
   0x6   :  { %v770_v19 = vsub.f32 %v196_v6, %v749_v10  ;;  %110 = vmatpush.msra.mxu2 %v78_v15  ;;  %53 = vmatpush.msra.mxu0 %v738_v4  ;;  %v79_v23 = vand.u32 4294901760, %v78_v15  ;;  %v85_v24 = vand.u32 4294901760, %v84_v16  ;;  %v778_v25 = vand.u32 4294901760, %v359_v14  ;;  %v357_v37 = vld [vmem:[%s865_s5] sm:$0xff] }
   0x7   :  { %v246_v21 = vsub.f32 %v28_v8, %v753_v12  ;;  %v775_v22 = vsub.f32 %v34_v9, %v765_v17  ;;  %137 = vmatpush.msra.mxu3 %v738_v4  ;;  %v241_v26 = vand.u32 4294901760, %v240_v20  ;;  %v788_v32 = vsub.f32 %v360_v13, %v767_v18 }
   0x8   :  { %v782_v28 = vand.u32 4294901760, %v770_v19  ;;  %113 = vmatpush.msra.mxu2 %v84_v16  ;;  %v80_v29 = vsub.f32 %v78_v15, %v79_v23  ;;  %162 = vmatpush.msrb.mxu0 %v79_v23  ;;  %v86_v31 = vsub.f32 %v84_v16, %v85_v24  ;;  %v409_v41 = vsub.f32 %v359_v14, %v778_v25 }
   0x9   :  { %v247_v27 = vand.u32 4294901760, %v246_v21  ;;  %v785_v30 = vand.u32 4294901760, %v775_v22  ;;  %116 = vmatmul.f32.vlgmr.msra.gmra.mxu2 %v775_v22  ;;  %v242_v33 = vsub.f32 %v240_v20, %v241_v26  ;;  %v404_v45 = vand.u32 4294901760, %v788_v32 }
   0xa   :  { %v219_v35 = vsub.f32 %v770_v19, %v782_v28  ;;  %213 = vmatpush.msrb.mxu2 %v751_v11  ;;  %v81_v38 = vand.u32 4294901760, %v80_v29  ;;  %v87_v40 = vand.u32 4294901760, %v86_v31  ;;  %166 = vmatpush.msrb.mxu0 %v85_v24  ;;  %v808_v46 = vand.u32 4294901760, %v358_v36 }
   0xb   :  { %v248_v34 = vsub.f32 %v246_v21, %v247_v27  ;;  %v57_v39 = vsub.f32 %v775_v22, %v785_v30  ;;  %141 = vmatmul.f32.vlgmr.msra.gmra.mxu3 %v785_v30  ;;  %v243_v42 = vand.u32 4294901760, %v242_v33  ;;  %v810_v47 = vand.u32 4294901760, %v357_v37 }
   0xc   :  { %82 = vmatpush.msra.mxu1 %v81_v38  ;;  %215 = vmatpush.msrb.mxu2 %v753_v12  ;;  %v220_v48 = vand.u32 4294901760, %v219_v35  ;;  %v410_v49 = vand.u32 4294901760, %v409_v41  ;;  %v562_v50 = vsub.f32 %v358_v36, %v808_v46  ;;  %v405_v52 = vsub.f32 %v788_v32, %v404_v45 }
   0xd   :  { %v249_v43 = vand.u32 4294901760, %v248_v34  ;;  %v804_v44 = vand.u32 4294901760, %v57_v39  ;;  %244 = vmatpush.msrb.mxu3 %v243_v42  ;;  %v568_v51 = vsub.f32 %v357_v37, %v810_v47 }
   0xe   :  { %324 = vmatpush.msra.mxu2 %v241_v26  ;;  %88 = vmatpush.msra.mxu1 %v87_v40  ;;  %v563_v53 = vand.u32 4294901760, %v562_v50  ;;  %v411_v54 = vsub.f32 %v409_v41, %v410_v49  ;;  %v406_v56 = vand.u32 4294901760, %v405_v52 }
   0xf   :  { %59 = vmatmul.f32.vlgmr.msra.gmra.mxu0 %v804_v44  ;;  %90 = vmatmul.f32.vlgmr.msra.gmra.mxu1 %v765_v17  ;;  %v569_v55 = vand.u32 4294901760, %v568_v51 }
  0x10   :  { %250 = vmatpush.msrb.mxu3 %v249_v43  ;;  %187 = vmatpush.msrb.mxu1 %v736_v3  ;;  %v564_v57 = vsub.f32 %v562_v50, %v563_v53  ;;  %v412_v58 = vand.u32 4294901760, %v411_v54 }
  0x11   :  { %272 = vmatpush.msra.mxu0 %v240_v20  ;;  %221 = vmatmul.f32.vlgmr.msrb.gmra.mxu2 %v220_v48  ;;  %v570_v59 = vsub.f32 %v568_v51, %v569_v55 }
  0x12   :  { %349 = vmatpush.msra.mxu3 %v751_v11  ;;  %189 = vmatpush.msrb.mxu1 %v738_v4  ;;  %v565_v60 = vand.u32 4294901760, %v564_v57 }
  0x13   :  { %252 = vmatmul.f32.vlgmr.msrb.gmra.mxu3 %v749_v10  ;;  %328 = vmatpush.msra.mxu2 %v247_v27  ;;  %v571_v61 = vand.u32 4294901760, %v570_v59 }
  0x14   :  { %297 = vmatpush.msra.mxu1 %v751_v11  ;;  %275 = vmatpush.msra.mxu0 %v246_v21 }
  0x15   :  { %351 = vmatpush.msra.mxu3 %v753_v12  ;;  %435 = vmatpush.msrb.mxu2 %v788_v32 }
  0x16   :  { %299 = vmatpush.msra.mxu1 %v753_v12 }
  0x17   :  { %168 = vmatmul.f32.vlgmr.msrb.gmra.mxu0 %v765_v17  ;;  %460 = vmatpush.msrb.mxu3 %v767_v18 }
  0x18   :  { %191 = vmatmul.f32.vlgmr.msrb.gmra.mxu1 %v765_v17  ;;  %376 = vmatpush.msrb.mxu0 %v767_v18 }
  0x19   :  { %407 = vmatpush.msrb.mxu1 %v406_v56  ;;  %438 = vmatpush.msrb.mxu2 %v409_v41  ;;  %v679_v41 = vld [vmem:[%s866_s2] sm:$0xff] }
  0x1a   :  { %330 = vmatmul.f32.vlgmr.msra.gmra.mxu2 %v749_v10  ;;  %378 = vmatpush.msrb.mxu0 %v778_v25 }
  0x1b   :  { %353 = vmatmul.f32.vlgmr.msra.gmra.mxu3 %v749_v10  ;;  %413 = vmatpush.msrb.mxu1 %v412_v58 }
  0x1c   :  { %462 = vmatpush.msrb.mxu3 %v778_v25  ;;  %535 = vmatpush.msra.mxu2 %v808_v46 }
  0x1e   :  { %566 = vmatpush.msra.mxu3 %v565_v60  ;;  %537 = vmatpush.msra.mxu2 %v810_v47 }
  0x1f   :  { %278 = vmatmul.f32.vlgmr.msra.gmra.mxu0 %v770_v19 }
  0x20   :  { %572 = vmatpush.msra.mxu3 %v571_v61  ;;  %303 = vmatmul.f32.vlgmr.msra.gmra.mxu1 %v782_v28 }
  0x21   :  { %487 = vmatpush.msra.mxu0 %v404_v45  ;;  %512 = vmatpush.msra.mxu1 %v767_v18 }
  0x22   :  { %441 = vmatmul.f32.vlgmr.msrb.gmra.mxu2 %v775_v22 }
  0x23   :  { %491 = vmatpush.msra.mxu0 %v410_v49  ;;  %466 = vmatmul.f32.vlgmr.msrb.gmra.mxu3 %v785_v30 }
  0x24   :  { %514 = vmatpush.msra.mxu1 %v778_v25  ;;  %646 = vmatpush.msrb.mxu2 %v563_v53 }
  0x25   :  { %671 = vmatpush.msrb.mxu3 %v808_v46 }
  0x26   :  { %650 = vmatpush.msrb.mxu2 %v569_v55 }
  0x27   :  { %673 = vmatpush.msrb.mxu3 %v810_v47  ;;  %384 = vmatmul.f32.vlgmr.msrb.gmra.mxu0 %v804_v44 }
  0x28   :  { %415 = vmatmul.f32.vlgmr.msrb.gmra.mxu1 %v765_v17  ;;  %594 = vmatpush.msrb.mxu0 %v562_v50 }
  0x29   :  { %619 = vmatpush.msrb.mxu1 %v808_v46 }
  0x2a   :  { %543 = vmatmul.f32.vlgmr.msra.gmra.mxu2 %v220_v48  ;;  %597 = vmatpush.msrb.mxu0 %v568_v51 }
  0x2b   :  { %574 = vmatmul.f32.vlgmr.msra.gmra.mxu3 %v749_v10  ;;  %621 = vmatpush.msrb.mxu1 %v810_v47 }
  0x2f   :  { %493 = vmatmul.f32.vlgmr.msra.gmra.mxu0 %v765_v17 }
  0x30   :  { %516 = vmatmul.f32.vlgmr.msra.gmra.mxu1 %v765_v17 }
  0x32   :  { %652 = vmatmul.f32.vlgmr.msrb.gmra.mxu2 %v749_v10 }
  0x33   :  { %675 = vmatmul.f32.vlgmr.msrb.gmra.mxu3 %v749_v10 }
  0x37   :  { %600 = vmatmul.f32.vlgmr.msrb.gmra.mxu0 %v770_v19 }
  0x38   :  { %625 = vmatmul.f32.vlgmr.msrb.gmra.mxu1 %v782_v28 }
  0x8c   :  { %v60_v62 = vpop.f32.mrf.mxu0  ;;  %v91_v63 = vpop.f32.mrf.mxu1 }
  0x8d   :  { %v117_v0 = vpop.f32.mrf.mxu2  ;;  %v92_v2 = vadd.f32 %v91_v63, %v60_v62 }
  0x8e   :  { %v142_v1 = vpop.f32.mrf.mxu3 }
  0x8f   :  { %v118_v3 = vadd.f32 %v117_v0, %v92_v2 }
  0x91   :  { %v143_v8 = vadd.f32 %v142_v1, %v118_v3 }
  0x94   :  { %v169_v4 = vpop.f32.mrf.mxu0 }
  0x95   :  { %v192_v5 = vpop.f32.mrf.mxu1  ;;  %v222_v6 = vpop.f32.mrf.mxu2  ;;  %v170_v9 = vadd.f32 %v169_v4, %v143_v8 }
  0x96   :  { %v253_v7 = vpop.f32.mrf.mxu3 }
  0x97   :  { %v193_v14 = vadd.f32 %v192_v5, %v170_v9 }
  0x99   :  { %v223_v15 = vadd.f32 %v222_v6, %v193_v14 }
  0x9b   :  { %v254_v21 = vadd.f32 %v253_v7, %v223_v15 }
  0x9c   :  { %v279_v11 = vpop.f32.mrf.mxu0 }
  0x9d   :  { %v304_v12 = vpop.f32.mrf.mxu1  ;;  %v331_v13 = vpop.f32.mrf.mxu2  ;;  %v280_v24 = vadd.f32 %v279_v11, %v254_v21 }
  0x9e   :  { %v354_v10 = vpop.f32.mrf.mxu3 }
  0x9f   :  { %v305_v30 = vadd.f32 %v304_v12, %v280_v24 }
  0xa1   :  { %v332_v33 = vadd.f32 %v331_v13, %v305_v30 }
  0xa3   :  { %v355_v39 = vadd.f32 %v354_v10, %v332_v33 }
  0xa4   :  { %v385_v16 = vpop.f32.mrf.mxu0 }
  0xa5   :  { %v416_v17 = vpop.f32.mrf.mxu1  ;;  %v442_v18 = vpop.f32.mrf.mxu2  ;;  %v680_v44 = vmul.f32 %v679_v41, %v355_v39 }
  0xa6   :  { %v417_v19 = vadd.f32 %v416_v17, %v385_v16  ;;  %v467_v20 = vpop.f32.mrf.mxu3 }
  0xa8   :  { %v443_v22 = vadd.f32 %v442_v18, %v417_v19 }
  0xaa   :  { %v468_v23 = vadd.f32 %v467_v20, %v443_v22 }
  0xac   :  { %v494_v25 = vpop.f32.mrf.mxu0 }
  0xad   :  { %v495_v26 = vadd.f32 %v494_v25, %v468_v23  ;;  %v517_v27 = vpop.f32.mrf.mxu1  ;;  %v544_v28 = vpop.f32.mrf.mxu2 }
  0xae   :  { %v575_v29 = vpop.f32.mrf.mxu3 }
  0xaf   :  { %v518_v31 = vadd.f32 %v517_v27, %v495_v26 }
  0xb1   :  { %v545_v32 = vadd.f32 %v544_v28, %v518_v31 }
  0xb3   :  { %v576_v34 = vadd.f32 %v575_v29, %v545_v32 }
  0xb4   :  { %v601_v35 = vpop.f32.mrf.mxu0 }
  0xb5   :  { %v602_v36 = vadd.f32 %v601_v35, %v576_v34  ;;  %v626_v37 = vpop.f32.mrf.mxu1  ;;  %v653_v38 = vpop.f32.mrf.mxu2 }
  0xb6   :  { %v676_v42 = vpop.f32.mrf.mxu3 }
  0xb7   :  { %v627_v40 = vadd.f32 %v626_v37, %v602_v36 }
  0xb9   :  { %v654_v43 = vadd.f32 %v653_v38, %v627_v40 }
  0xbb   :  { %v677_v45 = vadd.f32 %v676_v42, %v654_v43 }
  0xbd   :  { %v681_v46 = vadd.f32 %v680_v44, %v677_v45 }
  0xbf   :  { %682 = vst [vmem:[%s867_s7] sm:$0xff] %v681_v46 }

</bundles_post_ra>
